<compile_context>
chip_gen: v6e
topology: v6e:2x2x1
jax: 0.10.0
libtpu: 0.0.40
codegen_flags: <defaults>
</compile_context>

<pallas_src>
import functools
import numpy as np
import jax
import jax.numpy as jnp
from jax.experimental import pallas as pl
from jax.experimental.pallas import tpu as pltpu

_VMEM_LIMIT = 32 * 1024 * 1024   # within scoped-VMEM budget on v5e/v6e/v7x


# ----------------------------- generic tiled matmul ----------------------------

def _round_up(v, m):
    return (v + m - 1) // m * m


def _matmul_kernel(x_ref, w_ref, b_ref, o_ref, acc_ref, *, act):
    """o = act(x @ w + b); K is the last ("arbitrary") grid axis."""
    @pl.when(pl.program_id(2) == 0)
    def _():
        acc_ref[...] = jnp.zeros_like(acc_ref)

    acc_ref[...] += jnp.dot(x_ref[...], w_ref[...],
                            preferred_element_type=jnp.float32)

    @pl.when(pl.program_id(2) == pl.num_programs(2) - 1)
    def _():
        y = acc_ref[...] + b_ref[...]
        if act == 'relu':
            y = jnp.maximum(y, 0.0)
        elif act == 'sigmoid':
            y = jax.nn.sigmoid(y)
        o_ref[...] = y.astype(o_ref.dtype)


def pallas_matmul(x, w, b=None, act=None):
    """act(x @ w + b) with row/col/K tiling; every dim is zero-padded to its tile."""
    M, K = x.shape
    K2, N = w.shape
    assert K == K2
    tm = min(256, _round_up(M, 8))
    tn = min(512, _round_up(N, 128))
    tk = min(512, _round_up(K, 128))
    Mp, Kp, Np = _round_up(M, tm), _round_up(K, tk), _round_up(N, tn)

    xp = jnp.zeros((Mp, Kp), x.dtype).at[:M, :K].set(x)
    wp = jnp.zeros((Kp, Np), w.dtype).at[:K, :N].set(w)
    bp = jnp.zeros((1, Np), jnp.float32)
    if b is not None:
        bp = bp.at[0, :N].set(b.astype(jnp.float32))

    out = pl.pallas_call(
        functools.partial(_matmul_kernel, act=act),
        grid=(Mp // tm, Np // tn, Kp // tk),
        in_specs=[pl.BlockSpec((tm, tk), lambda i, j, k: (i, k)),
                  pl.BlockSpec((tk, tn), lambda i, j, k: (k, j)),
                  pl.BlockSpec((1, tn), lambda i, j, k: (0, j))],
        out_specs=pl.BlockSpec((tm, tn), lambda i, j, k: (i, j)),
        out_shape=jax.ShapeDtypeStruct((Mp, Np), jnp.float32),
        scratch_shapes=[pltpu.VMEM((tm, tn), jnp.float32)],
        compiler_params=pltpu.CompilerParams(
            dimension_semantics=("parallel", "parallel", "arbitrary"),
            vmem_limit_bytes=_VMEM_LIMIT),
    )(xp, wp, bp)
    return out[:M, :N]


# --------------------------- bidirectional GRU layer ----------------------------

def _bigru_layer_kernel(x_ref, lens_ref, h0_ref,
                        wih_f_ref, whh_f_ref, bih_f_ref, bhh_f_ref,
                        wih_b_ref, whh_b_ref, bih_b_ref, bhh_b_ref,
                        out_ref, hn_ref):
    """One bidirectional GRU layer over B walks of padded length L.

    Packed-sequence semantics: steps t >= length neither update the hidden state nor
    produce output (output is zero there), so the final hidden equals the hidden at
    each walk's last valid step (forward) / step 0 (backward).
    """
    B, L, Din = x_ref.shape
    H = whh_f_ref.shape[0]
    lens = lens_ref[...]                                        # (B, 1) f32

    # Batched input projections for both directions: (B*L, Din) x (Din, 3H) on the MXU.
    x2 = x_ref[...].astype(jnp.bfloat16).reshape(B * L, Din)
    gi_f = (jnp.dot(x2, wih_f_ref[...], preferred_element_type=jnp.float32)
            + bih_f_ref[...]).reshape(B, L, 3 * H)
    gi_b = (jnp.dot(x2, wih_b_ref[...], preferred_element_type=jnp.float32)
            + bih_b_ref[...]).reshape(B, L, 3 * H)

    def gru_cell(gi_t, h_prev, whh_ref, bhh_ref):
        gh = jnp.dot(h_prev.astype(jnp.bfloat16), whh_ref[...],
                     preferred_element_type=jnp.float32) + bhh_ref[...]
        r = jax.nn.sigmoid(gi_t[:, 0:H] + gh[:, 0:H])
        z = jax.nn.sigmoid(gi_t[:, H:2 * H] + gh[:, H:2 * H])
        n = jnp.tanh(gi_t[:, 2 * H:] + r * gh[:, 2 * H:])       # b_hn inside r*(.)
        return (1.0 - z) * n + z * h_prev

    # forward direction
    h = h0_ref[0]                                               # (B, H)
    for t in range(L):
        h_new = gru_cell(gi_f[:, t, :], h, whh_f_ref, bhh_f_ref)
        valid = (t < lens)                                      # (B, 1) bool
        h = jnp.where(valid, h_new, h)
        out_ref[:, t:t + 1, 0:H] = jnp.where(valid, h_new, 0.0)[:, None, :]
    hn_ref[0] = h

    # backward direction
    hb = h0_ref[1]
    for t in range(L - 1, -1, -1):
        h_new = gru_cell(gi_b[:, t, :], hb, whh_b_ref, bhh_b_ref)
        valid = (t < lens)
        hb = jnp.where(valid, h_new, hb)
        out_ref[:, t:t + 1, H:2 * H] = jnp.where(valid, h_new, 0.0)[:, None, :]
    hn_ref[1] = hb


def _pick_walk_batch(n_walks, cap=16):
    # Batch walks so the in-kernel matmuls have >=128 rows; keep blocks 8-aligned.
    cands = [b for b in range(1, min(n_walks, cap) + 1)
             if n_walks % b == 0 and (b % 8 == 0 or b == n_walks)]
    return max(cands) if cands else n_walks


def bigru_layer(x, lens, h0, lp, B):
    """x: (N,L,Din) f32, lens: (N,1) f32, h0: (2,N,H) f32 -> ((N,L,2H), (2,N,H))."""
    N, L, Din = x.shape
    H = h0.shape[-1]
    weights = [lp['wih_f'], lp['whh_f'], lp['bih_f'], lp['bhh_f'],
               lp['wih_b'], lp['whh_b'], lp['bih_b'], lp['bhh_b']]

    def full_spec(a):
        nd = a.ndim
        return pl.BlockSpec(a.shape, lambda i, _n=nd: (0,) * _n)

    in_specs = ([pl.BlockSpec((B, L, Din), lambda i: (i, 0, 0)),
                 pl.BlockSpec((B, 1), lambda i: (i, 0)),
                 pl.BlockSpec((2, B, H), lambda i: (0, i, 0))]
                + [full_spec(a) for a in weights])
    out_specs = (pl.BlockSpec((B, L, 2 * H), lambda i: (i, 0, 0)),
                 pl.BlockSpec((2, B, H), lambda i: (0, i, 0)))
    out_shape = (jax.ShapeDtypeStruct((N, L, 2 * H), jnp.float32),
                 jax.ShapeDtypeStruct((2, N, H), jnp.float32))
    return pl.pallas_call(
        _bigru_layer_kernel,
        grid=(N // B,),
        in_specs=in_specs,
        out_specs=out_specs,
        out_shape=out_shape,
        compiler_params=pltpu.CompilerParams(
            dimension_semantics=("parallel",),      # walks are independent (v7x: 2 TCs)
            vmem_limit_bytes=_VMEM_LIMIT),
    )(x.astype(jnp.float32), lens, h0, *weights)


# ------------------------------ scatter (one-hot) -------------------------------

def _scatter_onehot(index, dim_size, reduce):
    """Hoisted, (optionally) row-normalized one-hot in bf16; reused across layers."""
    index = np.asarray(index)
    M = index.shape[0]
    onehot = np.zeros((dim_size, M), np.float32)
    onehot[index, np.arange(M)] = 1.0
    if reduce == 'mean':
        onehot /= np.maximum(onehot.sum(axis=1, keepdims=True), 1.0)
    elif reduce not in ('sum', 'add'):
        # TODO(synk): max/min scatter reduces have no one-hot-matmul form.
        raise NotImplementedError(reduce)
    return jnp.asarray(onehot, jnp.bfloat16)


def pallas_scatter(onehot_bf16, src):
    return pallas_matmul(onehot_bf16, src.astype(jnp.bfloat16))


# ------------------------------- model glue -------------------------------------

def init_params(key, pe_in_dim, pe_out_dim, hid_dim, out_dim, num_layers, n_emb):
    H = hid_dim
    ks = iter(jax.random.split(key, 8 + 8 * num_layers))
    dense = lambda k, shape, s=0.1: jax.random.normal(k, shape, jnp.float32) * s
    emb = dense(next(ks), (n_emb, hid_dim), 0.3)
    emb = emb.at[n_emb - 1].set(0.0)                  # padding_idx = n_emb - 1
    params = {
        'embedding': emb,
        'pe_w': dense(next(ks), (pe_in_dim, pe_out_dim)),
        'pe_b': dense(next(ks), (pe_out_dim,)),
        'r0_w': dense(next(ks), (2 * H, 2 * H)),
        'r0_b': dense(next(ks), (2 * H,)),
        'r1_w': dense(next(ks), (2 * H, out_dim)),
        'r1_b': dense(next(ks), (out_dim,)),
        'layers': [],
    }
    for l in range(num_layers):
        din = (hid_dim + pe_out_dim) if l == 0 else 2 * H
        lp = {}
        for d in ('f', 'b'):                          # forward / backward direction
            lp['wih_' + d] = dense(next(ks), (din, 3 * H)).astype(jnp.bfloat16)
            lp['whh_' + d] = dense(next(ks), (H, 3 * H)).astype(jnp.bfloat16)
            lp['bih_' + d] = dense(next(ks), (1, 3 * H))
            lp['bhh_' + d] = dense(next(ks), (1, 3 * H))
        params['layers'].append(lp)
    return params


def rsnn_forward(params, walk_emb, walk_ids, walk_pe, lengths, reduce, num_layers):
    # TODO(synk): the host-side index bookkeeping below (one-hot build, valid-index
    # gather/write-back) mirrors the python loops of the PyTorch forward and is not
    # jit-traceable; it runs once per forward on concrete inputs.
    walk_emb = np.asarray(walk_emb)
    walk_ids = np.asarray(walk_ids)
    lengths = np.asarray(lengths)
    G = walk_ids.shape[0]
    N = walk_emb.shape[0]
    Lmax = int(lengths.max())
    H = params['embedding'].shape[1]
    pe_out = params['pe_w'].shape[1]

    # graph / node bookkeeping
    graph_ns = [int(walk_ids[i].max()) for i in range(G)]
    wi = walk_ids[:, :, :Lmax]
    offsets = np.zeros((G, 1, 1), np.int64)
    for i in range(1, G):
        offsets[i] = sum(graph_ns[:i]) + i
    walk_ids_flat = wi.reshape(-1)
    walk_ids_proc_flat = (wi + offsets).reshape(-1)
    valid_idx = np.nonzero(walk_ids_flat != -1)[0].astype(np.int32)
    ids_masked = walk_ids_proc_flat[valid_idx].astype(np.int32)
    num_nodes = int(ids_masked.max()) + 1
    valid_idx_j = jnp.asarray(valid_idx)
    ids_masked_j = jnp.asarray(ids_masked)

    # hoisted scatter matrices (built once, reused by every layer)
    node_onehot = _scatter_onehot(ids_masked, num_nodes, 'mean')
    graph_ids = np.concatenate([np.full(graph_ns[i] + 1, i, np.int64) for i in range(G)])
    graph_onehot = _scatter_onehot(graph_ids, G, reduce)

    # input features: embedding lookup (XLA gather) + pe projection (Pallas matmul)
    emb = jnp.take(params['embedding'], jnp.asarray(walk_emb[:, :Lmax]), axis=0)
    pe_flat = jnp.asarray(walk_pe)[:, :Lmax, :].reshape(N * Lmax, -1)
    pe_enc = pallas_matmul(pe_flat, params['pe_w'], params['pe_b']).reshape(N, Lmax, pe_out)
    x = jnp.concatenate([emb, pe_enc], axis=-1).astype(jnp.float32)       # (N, L, H+pe)

    lens2d = jnp.asarray(lengths.reshape(N, 1), jnp.float32)
    B = _pick_walk_batch(N)
    h = jnp.zeros((2, N, H), jnp.float32)                                 # GRU h0
    node_agg = None
    for l in range(num_layers):
        x, h = bigru_layer(x, lens2d, h, params['layers'][l], B)          # (N,L,2H),(2,N,H)
        x_flat = x.reshape(N * Lmax, 2 * H)
        node_src = x_flat[valid_idx_j]
        node_agg = pallas_scatter(node_onehot, node_src)                  # (nodes, 2H)
        if l != num_layers - 1:
            x_flat = x_flat.at[valid_idx_j].set(node_agg[ids_masked_j])
            x = x_flat.reshape(N, Lmax, 2 * H)

    xg = pallas_scatter(graph_onehot, node_agg)                           # (G, 2H)
    xg = pallas_matmul(xg, params['r0_w'], params['r0_b'], act='relu')
    out = pallas_matmul(xg, params['r1_w'], params['r1_b'], act='sigmoid')
    return out                                                            # (G, out_dim)


# ---------------------------------- main ----------------------------------------

if __name__ == "__main__":
    pe_in_dim, pe_out_dim, hid_dim, out_dim = 8, 64, 64, 4   # 2*hid = 128 (lane-dense)
    num_layers, n_emb, reduce = 2, 10, 'mean'
    G, Wn, L_full = 2, 16, 10                                # 2 graphs, 16 walks each
    N = G * Wn

    key = jax.random.PRNGKey(0)
    k_tok, k_pe, k_par = jax.random.split(key, 3)

    lengths = (4 + (np.arange(N) % 5)).astype(np.int32)      # lengths 4..8, max 8
    n_nodes = [5, 6]                                         # nodes per graph
    walk_ids = np.full((G, Wn, L_full), -1, dtype=np.int32)
    for g in range(G):
        for w in range(Wn):
            ln = int(lengths[g * Wn + w])
            for j in range(ln):
                walk_ids[g, w, j] = (w + j) % n_nodes[g]

    tok = np.asarray(jax.random.randint(k_tok, (N, L_full), 0, n_emb - 1))
    walk_emb = np.full((N, L_full), n_emb - 1, dtype=np.int32)   # pad token = n_emb-1
    for i in range(N):
        walk_emb[i, :lengths[i]] = tok[i, :lengths[i]]

    walk_pe = jax.random.normal(k_pe, (N, L_full, pe_in_dim), jnp.float32)

    params = init_params(k_par, pe_in_dim, pe_out_dim, hid_dim, out_dim, num_layers, n_emb)

    out = rsnn_forward(params, walk_emb, walk_ids, walk_pe, lengths, reduce, num_layers)
    out = jax.block_until_ready(out)
    assert out.shape == (G, out_dim)
    assert bool(jnp.all(jnp.isfinite(out)))
    assert bool(jnp.all((out >= 0.0) & (out <= 1.0)))        # sigmoid output
    print("KERNEL_OK")
</pallas_src>

<mosaic_0001>
module attributes {stable_mosaic.version = 11 : i64} {
  func.func @_matmul_kernel(%arg0: i32, %arg1: i32, %arg2: i32, %arg3: memref<256x128xf32, #tpu.memory_space<vmem>>, %arg4: memref<128x128xf32, #tpu.memory_space<vmem>>, %arg5: memref<1x128xf32, #tpu.memory_space<vmem>>, %arg6: memref<256x128xf32, #tpu.memory_space<vmem>>, %arg7: memref<256x128xf32, #tpu.memory_space<vmem>>) attributes {dimension_semantics = [#tpu.dimension_semantics<parallel>, #tpu.dimension_semantics<parallel>, #tpu.dimension_semantics<arbitrary>], iteration_bounds = array<i64: 1, 1, 1>, scalar_prefetch = 0 : i64, scratch_operands = 1 : i64, tpu.core_type = #tpu.core_type<tc>, window_params = [{transform_indices = @transform_0, window_bounds = array<i64: 256, 128>}, {transform_indices = @transform_1, window_bounds = array<i64: 128, 128>}, {transform_indices = @transform_2, window_bounds = array<i64: 1, 128>}, {transform_indices = @transform_3, window_bounds = array<i64: 256, 128>}]} {
    %c0_i32 = arith.constant 0 : i32
    %0 = arith.cmpi eq, %arg2, %c0_i32 : i32
    %1 = arith.extui %0 : i1 to i32
    %c0_i32_0 = arith.constant 0 : i32
    %2 = arith.cmpi ne, %1, %c0_i32_0 : i32
    scf.if %2 {
      %cst_10 = arith.constant 0.000000e+00 : f32
      %12 = vector.broadcast %cst_10 : f32 to vector<256x128xf32>
      %c0_11 = arith.constant 0 : index
      %c0_12 = arith.constant 0 : index
      %13 = vector.load %arg7[%c0_11, %c0_12] : memref<256x128xf32, #tpu.memory_space<vmem>>, vector<256x128xf32>
      tpu.vector_store %arg7[%c0_11, %c0_12], %12 {strides = array<i32>} : memref<256x128xf32, #tpu.memory_space<vmem>>, vector<256x128xf32>,
    } else {
    }
    %c0 = arith.constant 0 : index
    %c0_1 = arith.constant 0 : index
    %3 = vector.load %arg7[%c0, %c0_1] : memref<256x128xf32, #tpu.memory_space<vmem>>, vector<256x128xf32>
    %c0_2 = arith.constant 0 : index
    %c0_3 = arith.constant 0 : index
    %4 = vector.load %arg3[%c0_2, %c0_3] : memref<256x128xf32, #tpu.memory_space<vmem>>, vector<256x128xf32>
    %c0_4 = arith.constant 0 : index
    %c0_5 = arith.constant 0 : index
    %5 = vector.load %arg4[%c0_4, %c0_5] : memref<128x128xf32, #tpu.memory_space<vmem>>, vector<128x128xf32>
    %cst = arith.constant dense<0.000000e+00> : vector<256x128xf32>
    %6 = tpu.matmul %4, %5, %cst {dimension_numbers = #tpu.dot_dimension_numbers<[1], [0], [0], [1], [0, 0, 1, 1], [], []>} : vector<256x128xf32>, vector<128x128xf32>, vector<256x128xf32> -> vector<256x128xf32>
    %7 = arith.addf %3, %6 : vector<256x128xf32>
    %c0_6 = arith.constant 0 : index
    %c0_7 = arith.constant 0 : index
    %8 = vector.load %arg7[%c0_6, %c0_7] : memref<256x128xf32, #tpu.memory_space<vmem>>, vector<256x128xf32>
    tpu.vector_store %arg7[%c0_6, %c0_7], %7 {strides = array<i32>} : memref<256x128xf32, #tpu.memory_space<vmem>>, vector<256x128xf32>,
    %c0_i32_8 = arith.constant 0 : i32
    %9 = arith.cmpi eq, %arg2, %c0_i32_8 : i32
    %10 = arith.extui %9 : i1 to i32
    %c0_i32_9 = arith.constant 0 : i32
    %11 = arith.cmpi ne, %10, %c0_i32_9 : i32
    scf.if %11 {
      %c0_10 = arith.constant 0 : index
      %c0_11 = arith.constant 0 : index
      %12 = vector.load %arg7[%c0_10, %c0_11] : memref<256x128xf32, #tpu.memory_space<vmem>>, vector<256x128xf32>
      %c0_12 = arith.constant 0 : index
      %c0_13 = arith.constant 0 : index
      %13 = vector.load %arg5[%c0_12, %c0_13] : memref<1x128xf32, #tpu.memory_space<vmem>>, vector<1x128xf32>
      %14 = vector.broadcast %13 : vector<1x128xf32> to vector<256x128xf32>
      %15 = arith.addf %12, %14 : vector<256x128xf32>
      %c0_14 = arith.constant 0 : index
      %c0_15 = arith.constant 0 : index
      %16 = vector.load %arg6[%c0_14, %c0_15] : memref<256x128xf32, #tpu.memory_space<vmem>>, vector<256x128xf32>
      tpu.vector_store %arg6[%c0_14, %c0_15], %15 {strides = array<i32>} : memref<256x128xf32, #tpu.memory_space<vmem>>, vector<256x128xf32>,
    } else {
    }
    return
  }
  func.func @transform_0(%arg0: i32, %arg1: i32, %arg2: i32) -> (i32, i32) {
    %c0_i32 = arith.constant 0 : i32
    return %arg0, %arg2 : i32, i32
  }
  func.func @transform_1(%arg0: i32, %arg1: i32, %arg2: i32) -> (i32, i32) {
    %c0_i32 = arith.constant 0 : i32
    return %arg2, %arg1 : i32, i32
  }
  func.func @transform_2(%arg0: i32, %arg1: i32, %arg2: i32) -> (i32, i32) {
    %c0_i32 = arith.constant 0 : i32
    %c0_i32_0 = arith.constant 0 : i32
    return %c0_i32, %arg1 : i32, i32
  }
  func.func @transform_3(%arg0: i32, %arg1: i32, %arg2: i32) -> (i32, i32) {
    %c0_i32 = arith.constant 0 : i32
    return %arg0, %arg1 : i32, i32
  }
}

</mosaic_0001>

<bundles_post_ra>
// kernel: tpu_custom_call.1
= control target key start
LH: loop header
LB: loop body
LE: loop exit
PB: predicated region body
PF: predicated region fallthrough
CT: control target
= control target key end

     0   :  { %8 = vsyncpa [#allocation4], 0  ;;  %s884_s0 = inlined_call_operand.hbm [shape: f32[256,128], index: 0, kind: input, shape index: {}]   ;;  %s885_s1 = inlined_call_operand.hbm [shape: f32[128,128], index: 1, kind: input, shape index: {}]   ;;  %s886_s2 = inlined_call_operand.vmem [shape: f32[1,128], index: 2, kind: input, shape index: {}]   ;;  %s887_s3 = inlined_call_operand.hbm [shape: f32[256,128], index: 3, kind: output, shape index: {}]  }
   0x1   :  { %9 = vsyncpa [#allocation7], 0 }
   0x2   :  { %10 = vsyncpa [#allocation5], 0  ;;  %s804_s12 = smov [#allocation3]  }
   0x3   :  { %s16_s13 = sshll.u32 %s804_s12, 4  ;;  %s17_s13 = int_to_ptr.vmem [resolvable:$true] %s16_s13 }
   0x4   :  { %s746_s14 = scalar_lea.vmem %s17_s13, 4096  ;;  %p751_p1 = scmp.lt.s32.totalorder %s17_s13, %s17_s13 }
   0x5   :  { %p747_p0 = scmp.ne.s32.totalorder %s17_s13, %s746_s14  ;;  %p752_p2 = scmp.lt.s32.totalorder %s746_s14, %s746_s14 }
   0x7   :  { %p753_p3 = por %p752_p2, %p751_p1 }
   0x9   :  { %p754_p4 = pnand %p753_p3, %p747_p0 }
   0xb   :  { %757 = shalt.err (!%p754_p4)
}
   0xc   :  { %s805_s15 = smov 128   ;;  %s806_s16 = smov 8  }
   0xd   :  { %22 = dma.hbm_to_vmem [thread:$0]  %s884_s0, 4096, %s17_s13, [#allocation4], %s805_s15, %s805_s15, %s806_s16  }
   0xe   :  { %s807_s19 = smov [#allocation6]  }
   0xf   :  { %s28_s20 = sshll.u32 %s807_s19, 4  ;;  %s29_s20 = int_to_ptr.vmem [resolvable:$true] %s28_s20 }
  0x10   :  { %s766_s21 = scalar_lea.vmem %s29_s20, 2048  ;;  %p771_p6 = scmp.lt.s32.totalorder %s29_s20, %s29_s20 }
  0x11   :  { %p767_p5 = scmp.ne.s32.totalorder %s29_s20, %s766_s21  ;;  %p772_p7 = scmp.lt.s32.totalorder %s766_s21, %s766_s21 }
  0x13   :  { %p773_p8 = por %p772_p7, %p771_p6 }
  0x15   :  { %p774_p9 = pnand %p773_p8, %p767_p5 }
  0x17   :  { %777 = shalt.err (!%p774_p9)
}
  0x18   :  { %34 = dma.hbm_to_vmem [thread:$0]  %s885_s1, 2048, %s29_s20, [#allocation7], %s805_s15, %s805_s15, %s806_s16  }
  0x19   :  { %798 = dma.done.wait [#allocation4], 4096  }
  0x1a   :  { %799 = vsyncadd [#allocation4], 4294963200 }
  0x1b   :  { %800 = dma.done.wait [#allocation7], 2048  }
  0x1c   :  { %801 = vsyncadd [#allocation7], 4294965248  ;;  %v158_v0 = vld [vmem:[#allocation6 + $0x78] sm:$0xff]  ;;  %v157_v1 = vld [vmem:[#allocation6 + $0x70] sm:$0xff] }
  0x1d   :  { %621 = vmatprep.subr.mxu0 %v158_v0  ;;  %701 = vmatprep.subr.mxu1 %v158_v0  ;;  %v156_v2 = vld [vmem:[#allocation6 + $0x68] sm:$0xff]  ;;  %v155_v3 = vld [vmem:[#allocation6 + $0x60] sm:$0xff]  ;;  %v154_v4 = vld [vmem:[#allocation6 + $0x58] sm:$0xff] }
  0x1e   :  { %622 = vmatpush3.msra.mxu0 %v158_v0  ;;  %717 = vmatpush3.msra.mxu1 %v158_v0  ;;  %v153_v5 = vld [vmem:[#allocation6 + $0x50] sm:$0xff]  ;;  %v152_v6 = vld [vmem:[#allocation6 + $0x48] sm:$0xff]  ;;  %v151_v7 = vld [vmem:[#allocation6 + $0x40] sm:$0xff] }
  0x1f   :  { %623 = vmatprep.subr.mxu0 %v157_v1  ;;  %702 = vmatprep.subr.mxu1 %v157_v1  ;;  %v150_v8 = vld [vmem:[#allocation6 + $0x38] sm:$0xff]  ;;  %v149_v9 = vld [vmem:[#allocation6 + $0x30] sm:$0xff]  ;;  %v148_v10 = vld [vmem:[#allocation6 + $0x28] sm:$0xff] }
  0x20   :  { %624 = vmatpush3.msra.mxu0 %v157_v1  ;;  %718 = vmatpush3.msra.mxu1 %v157_v1  ;;  %v147_v11 = vld [vmem:[#allocation6 + $0x20] sm:$0xff]  ;;  %v146_v12 = vld [vmem:[#allocation6 + $0x18] sm:$0xff]  ;;  %v145_v13 = vld [vmem:[#allocation6 + $0x10] sm:$0xff] }
  0x21   :  { %625 = vmatprep.subr.mxu0 %v156_v2  ;;  %703 = vmatprep.subr.mxu1 %v156_v2  ;;  %v144_v14 = vld [vmem:[#allocation6 + $0x8] sm:$0xff]  ;;  %v143_v15 = vld [vmem:[#allocation6] sm:$0xff]  ;;  %v113_v20 = vld [vmem:[#allocation3 + $0x10] sm:$0xff] }
  0x22   :  { %626 = vmatpush3.msra.mxu0 %v156_v2  ;;  %719 = vmatpush3.msra.mxu1 %v156_v2  ;;  %v111_v16 = vld [vmem:[#allocation3] sm:$0xff]  ;;  %v112_v18 = vld [vmem:[#allocation3 + $0x8] sm:$0xff]  ;;  %v129_v21 = vld [vmem:[#allocation3 + $0x90] sm:$0xff] }
  0x23   :  { %627 = vmatprep.subr.mxu0 %v155_v3  ;;  %704 = vmatprep.subr.mxu1 %v155_v3  ;;  %v127_v17 = vld [vmem:[#allocation3 + $0x80] sm:$0xff]  ;;  %v128_v19 = vld [vmem:[#allocation3 + $0x88] sm:$0xff]  ;;  %v114_v22 = vld [vmem:[#allocation3 + $0x18] sm:$0xff] }
  0x24   :  { %628 = vmatpush3.msra.mxu0 %v155_v3  ;;  %720 = vmatpush3.msra.mxu1 %v155_v3  ;;  %v130_v23 = vld [vmem:[#allocation3 + $0x98] sm:$0xff]  ;;  %v115_v24 = vld [vmem:[#allocation3 + $0x20] sm:$0xff]  ;;  %v116_v26 = vld [vmem:[#allocation3 + $0x28] sm:$0xff] }
  0x25   :  { %629 = vmatprep.subr.mxu0 %v154_v4  ;;  %705 = vmatprep.subr.mxu1 %v154_v4  ;;  %v131_v25 = vld [vmem:[#allocation3 + $0xa0] sm:$0xff]  ;;  %v132_v27 = vld [vmem:[#allocation3 + $0xa8] sm:$0xff]  ;;  %v117_v28 = vld [vmem:[#allocation3 + $0x30] sm:$0xff] }
  0x26   :  { %630 = vmatpush3.msra.mxu0 %v154_v4  ;;  %721 = vmatpush3.msra.mxu1 %v154_v4  ;;  %v133_v29 = vld [vmem:[#allocation3 + $0xb0] sm:$0xff]  ;;  %v118_v30 = vld [vmem:[#allocation3 + $0x38] sm:$0xff]  ;;  %v119_v32 = vld [vmem:[#allocation3 + $0x40] sm:$0xff] }
  0x27   :  { %631 = vmatprep.subr.mxu0 %v153_v5  ;;  %706 = vmatprep.subr.mxu1 %v153_v5  ;;  %v134_v31 = vld [vmem:[#allocation3 + $0xb8] sm:$0xff]  ;;  %v135_v33 = vld [vmem:[#allocation3 + $0xc0] sm:$0xff]  ;;  %v120_v34 = vld [vmem:[#allocation3 + $0x48] sm:$0xff] }
  0x28   :  { %632 = vmatpush3.msra.mxu0 %v153_v5  ;;  %722 = vmatpush3.msra.mxu1 %v153_v5  ;;  %v136_v35 = vld [vmem:[#allocation3 + $0xc8] sm:$0xff]  ;;  %v121_v36 = vld [vmem:[#allocation3 + $0x50] sm:$0xff]  ;;  %v122_v38 = vld [vmem:[#allocation3 + $0x58] sm:$0xff] }
  0x29   :  { %633 = vmatprep.subr.mxu0 %v152_v6  ;;  %707 = vmatprep.subr.mxu1 %v152_v6  ;;  %v137_v37 = vld [vmem:[#allocation3 + $0xd0] sm:$0xff]  ;;  %v138_v39 = vld [vmem:[#allocation3 + $0xd8] sm:$0xff]  ;;  %v123_v40 = vld [vmem:[#allocation3 + $0x60] sm:$0xff] }
  0x2a   :  { %634 = vmatpush3.msra.mxu0 %v152_v6  ;;  %723 = vmatpush3.msra.mxu1 %v152_v6  ;;  %v139_v41 = vld [vmem:[#allocation3 + $0xe0] sm:$0xff]  ;;  %v124_v42 = vld [vmem:[#allocation3 + $0x68] sm:$0xff]  ;;  %v125_v44 = vld [vmem:[#allocation3 + $0x70] sm:$0xff] }
  0x2b   :  { %635 = vmatprep.subr.mxu0 %v151_v7  ;;  %708 = vmatprep.subr.mxu1 %v151_v7  ;;  %v140_v43 = vld [vmem:[#allocation3 + $0xe8] sm:$0xff]  ;;  %v141_v45 = vld [vmem:[#allocation3 + $0xf0] sm:$0xff]  ;;  %v126_v46 = vld [vmem:[#allocation3 + $0x78] sm:$0xff] }
  0x2c   :  { %636 = vmatpush3.msra.mxu0 %v151_v7  ;;  %724 = vmatpush3.msra.mxu1 %v151_v7  ;;  %v142_v47 = vld [vmem:[#allocation3 + $0xf8] sm:$0xff]  ;;  %v844_v48 = vld [vmem:[%s886_s2] ss:$0 sm:$0xff]  ;;  %s808_s2 = smov [#allocation8]  }
  0x2d   :  { %637 = vmatprep.subr.mxu0 %v150_v8  ;;  %709 = vmatprep.subr.mxu1 %v150_v8  ;;  %s559_s24 = sshll.u32 %s808_s2, 4  ;;  %s560_s24 = int_to_ptr.vmem [resolvable:$true] %s559_s24 }
  0x2e   :  { %638 = vmatpush3.msra.mxu0 %v150_v8  ;;  %725 = vmatpush3.msra.mxu1 %v150_v8  ;;  %s778_s25 = scalar_lea.vmem %s560_s24, 4096  ;;  %p783_p11 = scmp.lt.s32.totalorder %s560_s24, %s560_s24 }
  0x2f   :  { %639 = vmatprep.subr.mxu0 %v149_v9  ;;  %710 = vmatprep.subr.mxu1 %v149_v9  ;;  %p779_p10 = scmp.ne.s32.totalorder %s560_s24, %s778_s25  ;;  %p784_p12 = scmp.lt.s32.totalorder %s778_s25, %s778_s25 }
  0x30   :  { %640 = vmatpush3.msra.mxu0 %v149_v9  ;;  %726 = vmatpush3.msra.mxu1 %v149_v9 }
  0x31   :  { %641 = vmatprep.subr.mxu0 %v148_v10  ;;  %711 = vmatprep.subr.mxu1 %v148_v10  ;;  %p785_p13 = por %p784_p12, %p783_p11 }
  0x32   :  { %642 = vmatpush3.msra.mxu0 %v148_v10  ;;  %727 = vmatpush3.msra.mxu1 %v148_v10 }
  0x33   :  { %643 = vmatprep.subr.mxu0 %v147_v11  ;;  %712 = vmatprep.subr.mxu1 %v147_v11  ;;  %p786_p0 = pnand %p785_p13, %p779_p10 }
  0x34   :  { %644 = vmatpush3.msra.mxu0 %v147_v11  ;;  %728 = vmatpush3.msra.mxu1 %v147_v11 }
  0x35   :  { %645 = vmatprep.subr.mxu0 %v146_v12  ;;  %713 = vmatprep.subr.mxu1 %v146_v12 }
  0x36   :  { %646 = vmatpush3.msra.mxu0 %v146_v12  ;;  %729 = vmatpush3.msra.mxu1 %v146_v12 }
  0x37   :  { %647 = vmatprep.subr.mxu0 %v145_v13  ;;  %714 = vmatprep.subr.mxu1 %v145_v13 }
  0x38   :  { %648 = vmatpush3.msra.mxu0 %v145_v13  ;;  %730 = vmatpush3.msra.mxu1 %v145_v13 }
  0x39   :  { %649 = vmatprep.subr.mxu0 %v144_v14  ;;  %715 = vmatprep.subr.mxu1 %v144_v14 }
  0x3a   :  { %650 = vmatpush3.msra.mxu0 %v144_v14  ;;  %731 = vmatpush3.msra.mxu1 %v144_v14 }
  0x3b   :  { %651 = vmatprep.subr.mxu0 %v143_v15  ;;  %716 = vmatprep.subr.mxu1 %v143_v15 }
  0x3c   :  { %652 = vmatpush3.msra.mxu0 %v143_v15  ;;  %732 = vmatpush3.msra.mxu1 %v143_v15 }
  0x3d   :  { %653 = vmatprep.mubr.f32.mxu0 %v111_v16  ;;  %677 = vmatprep.mubr.f32.mxu1 %v127_v17 }
  0x3e   :  { %654 = vmatmul.mubr.f32.vlgmr.msra.gmra.mxu0 %v112_v18  ;;  %678 = vmatmul.mubr.f32.vlgmr.msra.gmra.mxu1 %v128_v19 }
  0x3f   :  { %656 = vmatprep.mubr.f32.mxu0 %v113_v20  ;;  %680 = vmatprep.mubr.f32.mxu1 %v129_v21 }
  0x42   :  { %657 = vmatmul.mubr.f32.gmra.mxu0 %v114_v22  ;;  %681 = vmatmul.mubr.f32.gmra.mxu1 %v130_v23 }
  0x43   :  { %659 = vmatprep.mubr.f32.mxu0 %v115_v24  ;;  %683 = vmatprep.mubr.f32.mxu1 %v131_v25 }
  0x46   :  { %660 = vmatmul.mubr.f32.gmra.mxu0 %v116_v26  ;;  %684 = vmatmul.mubr.f32.gmra.mxu1 %v132_v27 }
  0x47   :  { %662 = vmatprep.mubr.f32.mxu0 %v117_v28  ;;  %686 = vmatprep.mubr.f32.mxu1 %v133_v29 }
  0x4a   :  { %663 = vmatmul.mubr.f32.gmra.mxu0 %v118_v30  ;;  %687 = vmatmul.mubr.f32.gmra.mxu1 %v134_v31 }
  0x4b   :  { %665 = vmatprep.mubr.f32.mxu0 %v119_v32  ;;  %689 = vmatprep.mubr.f32.mxu1 %v135_v33 }
  0x4e   :  { %666 = vmatmul.mubr.f32.gmra.mxu0 %v120_v34  ;;  %690 = vmatmul.mubr.f32.gmra.mxu1 %v136_v35 }
  0x4f   :  { %668 = vmatprep.mubr.f32.mxu0 %v121_v36  ;;  %692 = vmatprep.mubr.f32.mxu1 %v137_v37 }
  0x52   :  { %669 = vmatmul.mubr.f32.gmra.mxu0 %v122_v38  ;;  %693 = vmatmul.mubr.f32.gmra.mxu1 %v138_v39 }
  0x53   :  { %671 = vmatprep.mubr.f32.mxu0 %v123_v40  ;;  %695 = vmatprep.mubr.f32.mxu1 %v139_v41 }
  0x56   :  { %672 = vmatmul.mubr.f32.gmra.mxu0 %v124_v42  ;;  %696 = vmatmul.mubr.f32.gmra.mxu1 %v140_v43 }
  0x57   :  { %674 = vmatprep.mubr.f32.mxu0 %v125_v44  ;;  %698 = vmatprep.mubr.f32.mxu1 %v141_v45 }
  0x5a   :  { %675 = vmatmul.mubr.f32.gmra.mxu0 %v126_v46  ;;  %699 = vmatmul.mubr.f32.gmra.mxu1 %v142_v47 }
  0xfe   :  { %v655_v49 = vpop.f32.mrf.mxu0  ;;  %v679_v50 = vpop.f32.mrf.mxu1 }
  0xff   :  { %v491_v51 = vadd.f32 %v655_v49, %v844_v48  ;;  %v507_v52 = vadd.f32 %v679_v50, %v844_v48 }
 0x100   :  { %v225_v53 = vpop.f32.mrf.mxu0  ;;  %v305_v54 = vpop.f32.mrf.mxu1 }
 0x101   :  { %523 = vst [vmem:[#allocation8 + $0x8] sm:$0xff] %v491_v51  ;;  %539 = vst [vmem:[#allocation8 + $0x88] sm:$0xff] %v507_v52  ;;  %v490_v55 = vadd.f32 %v844_v48, %v225_v53  ;;  %v506_v56 = vadd.f32 %v844_v48, %v305_v54 }
 0x102   :  { %v658_v57 = vpop.f32.mrf.mxu0  ;;  %v682_v58 = vpop.f32.mrf.mxu1 }
 0x103   :  { %522 = vst [vmem:[#allocation8] sm:$0xff] %v490_v55  ;;  %538 = vst [vmem:[#allocation8 + $0x80] sm:$0xff] %v506_v56  ;;  %v493_v59 = vadd.f32 %v658_v57, %v844_v48  ;;  %v509_v60 = vadd.f32 %v682_v58, %v844_v48 }
 0x104   :  { %v235_v61 = vpop.f32.mrf.mxu0  ;;  %v315_v62 = vpop.f32.mrf.mxu1 }
 0x105   :  { %525 = vst [vmem:[#allocation8 + $0x18] sm:$0xff] %v493_v59  ;;  %541 = vst [vmem:[#allocation8 + $0x98] sm:$0xff] %v509_v60  ;;  %v492_v63 = vadd.f32 %v844_v48, %v235_v61  ;;  %v508_v0 = vadd.f32 %v844_v48, %v315_v62 }
 0x106   :  { %v661_v1 = vpop.f32.mrf.mxu0  ;;  %v685_v2 = vpop.f32.mrf.mxu1 }
 0x107   :  { %524 = vst [vmem:[#allocation8 + $0x10] sm:$0xff] %v492_v63  ;;  %540 = vst [vmem:[#allocation8 + $0x90] sm:$0xff] %v508_v0  ;;  %v495_v3 = vadd.f32 %v661_v1, %v844_v48  ;;  %v511_v4 = vadd.f32 %v685_v2, %v844_v48 }
 0x108   :  { %v245_v5 = vpop.f32.mrf.mxu0  ;;  %v325_v6 = vpop.f32.mrf.mxu1 }
 0x109   :  { %527 = vst [vmem:[#allocation8 + $0x28] sm:$0xff] %v495_v3  ;;  %543 = vst [vmem:[#allocation8 + $0xa8] sm:$0xff] %v511_v4  ;;  %v494_v7 = vadd.f32 %v844_v48, %v245_v5  ;;  %v510_v8 = vadd.f32 %v844_v48, %v325_v6 }
 0x10a   :  { %v664_v9 = vpop.f32.mrf.mxu0  ;;  %v688_v10 = vpop.f32.mrf.mxu1 }
 0x10b   :  { %526 = vst [vmem:[#allocation8 + $0x20] sm:$0xff] %v494_v7  ;;  %542 = vst [vmem:[#allocation8 + $0xa0] sm:$0xff] %v510_v8  ;;  %v497_v11 = vadd.f32 %v664_v9, %v844_v48  ;;  %v513_v12 = vadd.f32 %v688_v10, %v844_v48 }
 0x10c   :  { %v255_v13 = vpop.f32.mrf.mxu0  ;;  %v335_v14 = vpop.f32.mrf.mxu1 }
 0x10d   :  { %529 = vst [vmem:[#allocation8 + $0x38] sm:$0xff] %v497_v11  ;;  %545 = vst [vmem:[#allocation8 + $0xb8] sm:$0xff] %v513_v12  ;;  %v496_v15 = vadd.f32 %v844_v48, %v255_v13  ;;  %v512_v16 = vadd.f32 %v844_v48, %v335_v14 }
 0x10e   :  { %v667_v17 = vpop.f32.mrf.mxu0  ;;  %v691_v18 = vpop.f32.mrf.mxu1 }
 0x10f   :  { %528 = vst [vmem:[#allocation8 + $0x30] sm:$0xff] %v496_v15  ;;  %544 = vst [vmem:[#allocation8 + $0xb0] sm:$0xff] %v512_v16  ;;  %v499_v19 = vadd.f32 %v667_v17, %v844_v48  ;;  %v515_v20 = vadd.f32 %v691_v18, %v844_v48 }
 0x110   :  { %v265_v21 = vpop.f32.mrf.mxu0  ;;  %v345_v22 = vpop.f32.mrf.mxu1 }
 0x111   :  { %531 = vst [vmem:[#allocation8 + $0x48] sm:$0xff] %v499_v19  ;;  %547 = vst [vmem:[#allocation8 + $0xc8] sm:$0xff] %v515_v20  ;;  %v498_v23 = vadd.f32 %v844_v48, %v265_v21  ;;  %v514_v24 = vadd.f32 %v844_v48, %v345_v22 }
 0x112   :  { %v670_v25 = vpop.f32.mrf.mxu0  ;;  %v694_v26 = vpop.f32.mrf.mxu1 }
 0x113   :  { %530 = vst [vmem:[#allocation8 + $0x40] sm:$0xff] %v498_v23  ;;  %546 = vst [vmem:[#allocation8 + $0xc0] sm:$0xff] %v514_v24  ;;  %v501_v27 = vadd.f32 %v670_v25, %v844_v48  ;;  %v517_v28 = vadd.f32 %v694_v26, %v844_v48 }
 0x114   :  { %v275_v29 = vpop.f32.mrf.mxu0  ;;  %v355_v30 = vpop.f32.mrf.mxu1 }
 0x115   :  { %533 = vst [vmem:[#allocation8 + $0x58] sm:$0xff] %v501_v27  ;;  %549 = vst [vmem:[#allocation8 + $0xd8] sm:$0xff] %v517_v28  ;;  %v500_v31 = vadd.f32 %v844_v48, %v275_v29  ;;  %v516_v32 = vadd.f32 %v844_v48, %v355_v30 }
 0x116   :  { %v673_v33 = vpop.f32.mrf.mxu0  ;;  %v697_v34 = vpop.f32.mrf.mxu1 }
 0x117   :  { %532 = vst [vmem:[#allocation8 + $0x50] sm:$0xff] %v500_v31  ;;  %548 = vst [vmem:[#allocation8 + $0xd0] sm:$0xff] %v516_v32  ;;  %v503_v35 = vadd.f32 %v673_v33, %v844_v48  ;;  %v519_v36 = vadd.f32 %v697_v34, %v844_v48 }
 0x118   :  { %v285_v37 = vpop.f32.mrf.mxu0  ;;  %v365_v38 = vpop.f32.mrf.mxu1 }
 0x119   :  { %535 = vst [vmem:[#allocation8 + $0x68] sm:$0xff] %v503_v35  ;;  %551 = vst [vmem:[#allocation8 + $0xe8] sm:$0xff] %v519_v36  ;;  %v502_v39 = vadd.f32 %v844_v48, %v285_v37  ;;  %v518_v40 = vadd.f32 %v844_v48, %v365_v38 }
 0x11a   :  { %v676_v41 = vpop.f32.mrf.mxu0  ;;  %v700_v42 = vpop.f32.mrf.mxu1 }
 0x11b   :  { %534 = vst [vmem:[#allocation8 + $0x60] sm:$0xff] %v502_v39  ;;  %550 = vst [vmem:[#allocation8 + $0xe0] sm:$0xff] %v518_v40  ;;  %v505_v43 = vadd.f32 %v676_v41, %v844_v48  ;;  %v521_v44 = vadd.f32 %v700_v42, %v844_v48 }
 0x11c   :  { %v295_v45 = vpop.f32.mrf.mxu0  ;;  %v375_v46 = vpop.f32.mrf.mxu1 }
 0x11d   :  { %537 = vst [vmem:[#allocation8 + $0x78] sm:$0xff] %v505_v43  ;;  %553 = vst [vmem:[#allocation8 + $0xf8] sm:$0xff] %v521_v44  ;;  %v504_v47 = vadd.f32 %v844_v48, %v295_v45  ;;  %v520_v49 = vadd.f32 %v844_v48, %v375_v46 }
 0x11f   :  { %536 = vst [vmem:[#allocation8 + $0x70] sm:$0xff] %v504_v47  ;;  %552 = vst [vmem:[#allocation8 + $0xf0] sm:$0xff] %v520_v49 }
 0x120   :  { %789 = shalt.err (!%p786_p0)
}
 0x121   :  { %565 = dma.vmem_to_hbm [thread:$0]  %s560_s24, 4096, %s887_s3, [#allocation5], %s805_s15, %s805_s15, %s806_s16  }
 0x122   :  { %802 = dma.done.wait [#allocation5], 4096  }
 0x123   :  { %803 = vsyncadd [#allocation5], 4294963200 }
 0x124   :  { %569 = vsyncpa [#allocation4], 1 }
 0x125   :  { %570 = vsyncpa [#allocation7], 1 }
 0x126   :  { %571 = vsyncpa [#allocation5], 1 }

</bundles_post_ra>
